<compile_context>
chip_gen: v5e
topology: v5e:2x2
jax: 0.10.0
libtpu: 0.0.40
codegen_flags: <defaults>
</compile_context>

<pallas_src>
import functools

import jax
import jax.numpy as jnp
from jax.experimental import pallas as pl
from jax.experimental.pallas import tpu as pltpu

LANE = 128          # in-kernel lane padding for the logit dim
HIDDEN = 256
NEG_INF = -1e30     # padding bias so exp() underflows to exactly 0


def _round_up(x, m):
    return (x + m - 1) // m * m


def _pick_batch_tile(B, block_b):
    """Largest batch tile (multiple of 8, <= block_b) with <=~12.5% padding waste."""
    block_b = max(8, _round_up(block_b, 8))
    full = _round_up(B, 8)
    if full <= block_b:
        return full                      # single tile, minimal padding
    tb = block_b
    while tb >= 16:
        if (_round_up(B, tb) - B) * 8 <= B:   # padded rows <= 12.5% of B
            return tb
        tb = max(8, (tb // 2) // 8 * 8)
    return 8


def _policy_kernel(x_ref, w1_ref, b1_ref, w2_ref, b2_ref, w3_ref, b3_ref,
                   p_ref, lp_ref, *, action_dim: int):
    # Matmul inputs in bf16, accumulate in f32 on the MXU; elementwise in f32.
    x = x_ref[...]
    if x.dtype != jnp.bfloat16:
        x = x.astype(jnp.bfloat16)

    h1 = jnp.dot(x, w1_ref[...], preferred_element_type=jnp.float32) + b1_ref[...]
    h1 = jnp.maximum(h1, 0.0)

    h2 = jnp.dot(h1.astype(jnp.bfloat16), w2_ref[...],
                 preferred_element_type=jnp.float32) + b2_ref[...]
    h2 = jnp.maximum(h2, 0.0)

    # Lane-padded logits: w3 is [256, 128] (zeros in padded cols), b3 padded
    # with -1e30 -> padded lanes never win the max and exp() -> exactly 0.
    z = jnp.dot(h2.astype(jnp.bfloat16), w3_ref[...],
                preferred_element_type=jnp.float32) + b3_ref[...]

    z_max = jnp.max(z, axis=-1, keepdims=True)
    shifted = z - z_max
    ez = jnp.exp(shifted)
    denom = jnp.sum(ez, axis=-1, keepdims=True)

    probs = ez / denom                       # exact: sums to 1 within f32 rounding
    log_probs = shifted - jnp.log(denom)

    # Store only the real action_dim columns (masked stores, tiny HBM traffic).
    p_ref[...] = probs[:, :action_dim].astype(p_ref.dtype)
    lp_ref[...] = log_probs[:, :action_dim].astype(lp_ref.dtype)


def prepare_params(params):
    """Raw f32 torch-layout params -> kernel params (bf16 weights, padded W3/b3)."""
    w3 = params["w3"]
    b3 = params["b3"]
    action_dim = w3.shape[1]
    pad = LANE - action_dim
    if pad < 0:
        raise ValueError("action_dim > 128 not handled in this kernel")
    w3p = jnp.pad(w3, ((0, 0), (0, pad)))                          # zeros
    b3p = jnp.pad(b3, ((0, 0), (0, pad)), constant_values=NEG_INF)
    return {
        "w1": params["w1"].astype(jnp.bfloat16),
        "b1": params["b1"].astype(jnp.float32),
        "w2": params["w2"].astype(jnp.bfloat16),
        "b2": params["b2"].astype(jnp.float32),
        "w3": w3p.astype(jnp.bfloat16),
        "b3": b3p.astype(jnp.float32),
    }


def policy_net_probs_and_log_probs(x, kp, action_dim, *, block_b=1024,
                                   dimension_semantics=("parallel",)):
    """Fused forward.  x: [B, state_dim] (f32 or bf16).  Returns (probs, log_probs)."""
    B, S = x.shape

    tb = _pick_batch_tile(B, block_b)
    b_pad = _round_up(B, tb)
    if b_pad != B:
        x = jnp.pad(x, ((0, b_pad - B), (0, 0)))
    grid = (b_pad // tb,)

    kernel = functools.partial(_policy_kernel, action_dim=int(action_dim))
    resident = lambda a: pl.BlockSpec(a.shape, lambda i: (0,) * a.ndim)

    probs, log_probs = pl.pallas_call(
        kernel,
        out_shape=(jax.ShapeDtypeStruct((b_pad, action_dim), jnp.float32),
                   jax.ShapeDtypeStruct((b_pad, action_dim), jnp.float32)),
        grid=grid,
        in_specs=[
            pl.BlockSpec((tb, S), lambda i: (i, 0)),      # x: streamed per tile
            resident(kp["w1"]), resident(kp["b1"]),       # weights: VMEM-resident
            resident(kp["w2"]), resident(kp["b2"]),
            resident(kp["w3"]), resident(kp["b3"]),
        ],
        out_specs=[
            pl.BlockSpec((tb, action_dim), lambda i: (i, 0)),   # probs
            pl.BlockSpec((tb, action_dim), lambda i: (i, 0)),   # log_probs
        ],
        compiler_params=pltpu.CompilerParams(
            # On v7x pass dimension_semantics=(pltpu.CORE_PARALLEL,) to shard
            # the batch axis across both TensorCores.
            dimension_semantics=tuple(dimension_semantics),
            vmem_limit_bytes=32 * 1024 * 1024,            # ample up to block_b=2048
        ),
    )(x, kp["w1"], kp["b1"], kp["w2"], kp["b2"], kp["w3"], kp["b3"])

    return probs[:B], log_probs[:B]


def policy_net_forward(x, kp, action_dim, require_log_prob=False, **kwargs):
    """Flag-style API matching the torch forward(); reuses the fused kernel."""
    probs, log_probs = policy_net_probs_and_log_probs(x, kp, action_dim, **kwargs)
    return log_probs if require_log_prob else probs


def init_params(key, state_dim, action_dim, hidden=HIDDEN):
    """torch.nn.Linear-style init (uniform +/- 1/sqrt(fan_in)), f32 torch layout."""
    ks = jax.random.split(key, 6)

    def lin(kw, kb, fan_in, fan_out):
        bound = 1.0 / jnp.sqrt(fan_in)
        w = jax.random.uniform(kw, (fan_in, fan_out), jnp.float32, -bound, bound)
        b = jax.random.uniform(kb, (1, fan_out), jnp.float32, -bound, bound)
        return w, b

    w1, b1 = lin(ks[0], ks[1], state_dim, hidden)
    w2, b2 = lin(ks[2], ks[3], hidden, hidden)
    w3, b3 = lin(ks[4], ks[5], hidden, action_dim)
    return {"w1": w1, "b1": b1, "w2": w2, "b2": b2, "w3": w3, "b3": b3}


if __name__ == "__main__":
    key = jax.random.PRNGKey(0)
    k_param, k_x = jax.random.split(key)

    batch = 2
    state_dim = 16
    action_dim = 8

    raw = init_params(k_param, state_dim, action_dim)
    kp = prepare_params(raw)
    x = jax.random.normal(k_x, (batch, state_dim), dtype=jnp.float32)

    # One fused call produces both (this is the SAC-discrete usage pattern).
    probs, log_probs = policy_net_probs_and_log_probs(x, kp, action_dim)
    jax.block_until_ready((probs, log_probs))

    # Flag-style API (matches the torch module's forward signature).
    lp_flag = policy_net_forward(x, kp, action_dim, require_log_prob=True)
    jax.block_until_ready(lp_flag)

    # Pure-JAX reference with the same bf16-weight / f32-accumulation semantics.
    def ref(x, kp, action_dim, log_p):
        xb = x.astype(jnp.bfloat16)
        h1 = jnp.maximum(
            jnp.dot(xb, kp["w1"], preferred_element_type=jnp.float32) + kp["b1"], 0.0)
        h2 = jnp.maximum(
            jnp.dot(h1.astype(jnp.bfloat16), kp["w2"],
                    preferred_element_type=jnp.float32) + kp["b2"], 0.0)
        z = jnp.dot(h2.astype(jnp.bfloat16), kp["w3"],
                    preferred_element_type=jnp.float32) + kp["b3"]
        z = z[:, :action_dim]
        return jax.nn.log_softmax(z, -1) if log_p else jax.nn.softmax(z, -1)

    ref_p = ref(x, kp, action_dim, False)
    ref_lp = ref(x, kp, action_dim, True)

    assert probs.shape == (batch, action_dim)
    assert log_probs.shape == (batch, action_dim)
    assert jnp.allclose(probs, ref_p, atol=2e-3, rtol=2e-3), "softmax mismatch"
    assert jnp.allclose(log_probs, ref_lp, atol=1e-2, rtol=1e-2), "log_softmax mismatch"
    assert jnp.allclose(lp_flag, log_probs, atol=1e-6), "flag API mismatch"
    assert jnp.allclose(jnp.sum(probs, axis=-1), 1.0, atol=1e-5), "probs don't sum to 1"

    print("KERNEL_OK")
</pallas_src>

<mosaic_0001>
module attributes {stable_mosaic.version = 11 : i64} {
  func.func @_policy_kernel(%arg0: i32, %arg1: memref<8x16xf32, #tpu.memory_space<vmem>>, %arg2: memref<16x256xbf16, #tpu.memory_space<vmem>>, %arg3: memref<1x256xf32, #tpu.memory_space<vmem>>, %arg4: memref<256x256xbf16, #tpu.memory_space<vmem>>, %arg5: memref<1x256xf32, #tpu.memory_space<vmem>>, %arg6: memref<256x128xbf16, #tpu.memory_space<vmem>>, %arg7: memref<1x128xf32, #tpu.memory_space<vmem>>, %arg8: memref<8x8xf32, #tpu.memory_space<vmem>>, %arg9: memref<8x8xf32, #tpu.memory_space<vmem>>) attributes {dimension_semantics = [#tpu.dimension_semantics<parallel>], iteration_bounds = array<i64: 1>, scalar_prefetch = 0 : i64, scratch_operands = 0 : i64, tpu.core_type = #tpu.core_type<tc>, window_params = [{transform_indices = @transform_0, window_bounds = array<i64: 8, 16>}, {pipeline_mode = #tpu.pipeline_mode<synchronous>, transform_indices = @transform_1, window_bounds = array<i64: 16, 256>}, {pipeline_mode = #tpu.pipeline_mode<synchronous>, transform_indices = @transform_2, window_bounds = array<i64: 1, 256>}, {pipeline_mode = #tpu.pipeline_mode<synchronous>, transform_indices = @transform_3, window_bounds = array<i64: 256, 256>}, {pipeline_mode = #tpu.pipeline_mode<synchronous>, transform_indices = @transform_4, window_bounds = array<i64: 1, 256>}, {pipeline_mode = #tpu.pipeline_mode<synchronous>, transform_indices = @transform_5, window_bounds = array<i64: 256, 128>}, {pipeline_mode = #tpu.pipeline_mode<synchronous>, transform_indices = @transform_6, window_bounds = array<i64: 1, 128>}, {transform_indices = @transform_7, window_bounds = array<i64: 8, 8>}, {transform_indices = @transform_8, window_bounds = array<i64: 8, 8>}]} {
    %c0 = arith.constant 0 : index
    %c0_0 = arith.constant 0 : index
    %0 = vector.load %arg1[%c0, %c0_0] : memref<8x16xf32, #tpu.memory_space<vmem>>, vector<8x16xf32>
    %1 = arith.truncf %0 : vector<8x16xf32> to vector<8x16xbf16>
    %c0_1 = arith.constant 0 : index
    %c0_2 = arith.constant 0 : index
    %2 = vector.load %arg2[%c0_1, %c0_2] : memref<16x256xbf16, #tpu.memory_space<vmem>>, vector<16x256xbf16>
    %cst = arith.constant dense<0.000000e+00> : vector<8x256xf32>
    %3 = tpu.matmul %1, %2, %cst {dimension_numbers = #tpu.dot_dimension_numbers<[1], [0], [0], [1], [0, 0, 1, 1], [], []>} : vector<8x16xbf16>, vector<16x256xbf16>, vector<8x256xf32> -> vector<8x256xf32>
    %c0_3 = arith.constant 0 : index
    %c0_4 = arith.constant 0 : index
    %4 = vector.load %arg3[%c0_3, %c0_4] : memref<1x256xf32, #tpu.memory_space<vmem>>, vector<1x256xf32>
    %5 = vector.broadcast %4 : vector<1x256xf32> to vector<8x256xf32>
    %6 = arith.addf %3, %5 : vector<8x256xf32>
    %cst_5 = arith.constant 0.000000e+00 : f32
    %7 = vector.broadcast %cst_5 : f32 to vector<8x256xf32>
    %8 = arith.maximumf %6, %7 : vector<8x256xf32>
    %9 = arith.truncf %8 : vector<8x256xf32> to vector<8x256xbf16>
    %c0_6 = arith.constant 0 : index
    %c0_7 = arith.constant 0 : index
    %10 = vector.load %arg4[%c0_6, %c0_7] : memref<256x256xbf16, #tpu.memory_space<vmem>>, vector<256x256xbf16>
    %cst_8 = arith.constant dense<0.000000e+00> : vector<8x256xf32>
    %11 = tpu.matmul %9, %10, %cst_8 {dimension_numbers = #tpu.dot_dimension_numbers<[1], [0], [0], [1], [0, 0, 1, 1], [], []>} : vector<8x256xbf16>, vector<256x256xbf16>, vector<8x256xf32> -> vector<8x256xf32>
    %c0_9 = arith.constant 0 : index
    %c0_10 = arith.constant 0 : index
    %12 = vector.load %arg5[%c0_9, %c0_10] : memref<1x256xf32, #tpu.memory_space<vmem>>, vector<1x256xf32>
    %13 = vector.broadcast %12 : vector<1x256xf32> to vector<8x256xf32>
    %14 = arith.addf %11, %13 : vector<8x256xf32>
    %cst_11 = arith.constant 0.000000e+00 : f32
    %15 = vector.broadcast %cst_11 : f32 to vector<8x256xf32>
    %16 = arith.maximumf %14, %15 : vector<8x256xf32>
    %17 = arith.truncf %16 : vector<8x256xf32> to vector<8x256xbf16>
    %c0_12 = arith.constant 0 : index
    %c0_13 = arith.constant 0 : index
    %18 = vector.load %arg6[%c0_12, %c0_13] : memref<256x128xbf16, #tpu.memory_space<vmem>>, vector<256x128xbf16>
    %cst_14 = arith.constant dense<0.000000e+00> : vector<8x128xf32>
    %19 = tpu.matmul %17, %18, %cst_14 {dimension_numbers = #tpu.dot_dimension_numbers<[1], [0], [0], [1], [0, 0, 1, 1], [], []>} : vector<8x256xbf16>, vector<256x128xbf16>, vector<8x128xf32> -> vector<8x128xf32>
    %c0_15 = arith.constant 0 : index
    %c0_16 = arith.constant 0 : index
    %20 = vector.load %arg7[%c0_15, %c0_16] : memref<1x128xf32, #tpu.memory_space<vmem>>, vector<1x128xf32>
    %21 = vector.broadcast %20 : vector<1x128xf32> to vector<8x128xf32>
    %22 = arith.addf %19, %21 : vector<8x128xf32>
    %cst_17 = arith.constant dense<0xFF800000> : vector<8xf32>
    %23 = vector.multi_reduction <maximumf>, %22, %cst_17 [1] : vector<8x128xf32> to vector<8xf32>
    %24 = vector.shape_cast %23 : vector<8xf32> to vector<8x1xf32>
    %25 = vector.broadcast %24 : vector<8x1xf32> to vector<8x128xf32>
    %26 = arith.subf %22, %25 : vector<8x128xf32>
    %27 = math.exp %26 : vector<8x128xf32>
    %cst_18 = arith.constant dense<0.000000e+00> : vector<8xf32>
    %28 = vector.multi_reduction <add>, %27, %cst_18 [1] : vector<8x128xf32> to vector<8xf32>
    %29 = vector.shape_cast %28 : vector<8xf32> to vector<8x1xf32>
    %30 = vector.broadcast %29 : vector<8x1xf32> to vector<8x128xf32>
    %31 = arith.divf %27, %30 : vector<8x128xf32>
    %32 = math.log %29 : vector<8x1xf32>
    %33 = vector.broadcast %32 : vector<8x1xf32> to vector<8x128xf32>
    %34 = arith.subf %26, %33 : vector<8x128xf32>
    %35 = vector.extract_strided_slice %31 {offsets = [0, 0], sizes = [8, 8], strides = [1, 1]} : vector<8x128xf32> to vector<8x8xf32>
    %c0_19 = arith.constant 0 : index
    %c0_20 = arith.constant 0 : index
    %36 = vector.load %arg8[%c0_19, %c0_20] : memref<8x8xf32, #tpu.memory_space<vmem>>, vector<8x8xf32>
    tpu.vector_store %arg8[%c0_19, %c0_20], %35 {strides = array<i32>} : memref<8x8xf32, #tpu.memory_space<vmem>>, vector<8x8xf32>,
    %37 = vector.extract_strided_slice %34 {offsets = [0, 0], sizes = [8, 8], strides = [1, 1]} : vector<8x128xf32> to vector<8x8xf32>
    %c0_21 = arith.constant 0 : index
    %c0_22 = arith.constant 0 : index
    %38 = vector.load %arg9[%c0_21, %c0_22] : memref<8x8xf32, #tpu.memory_space<vmem>>, vector<8x8xf32>
    tpu.vector_store %arg9[%c0_21, %c0_22], %37 {strides = array<i32>} : memref<8x8xf32, #tpu.memory_space<vmem>>, vector<8x8xf32>,
    return
  }
  func.func @transform_0(%arg0: i32) -> (i32, i32) {
    %c0_i32 = arith.constant 0 : i32
    %c0_i32_0 = arith.constant 0 : i32
    return %arg0, %c0_i32 : i32, i32
  }
  func.func @transform_1(%arg0: i32) -> (i32, i32) {
    %c0_i32 = arith.constant 0 : i32
    %c0_i32_0 = arith.constant 0 : i32
    %c0_i32_1 = arith.constant 0 : i32
    return %c0_i32, %c0_i32_0 : i32, i32
  }
  func.func @transform_2(%arg0: i32) -> (i32, i32) {
    %c0_i32 = arith.constant 0 : i32
    %c0_i32_0 = arith.constant 0 : i32
    %c0_i32_1 = arith.constant 0 : i32
    return %c0_i32, %c0_i32_0 : i32, i32
  }
  func.func @transform_3(%arg0: i32) -> (i32, i32) {
    %c0_i32 = arith.constant 0 : i32
    %c0_i32_0 = arith.constant 0 : i32
    %c0_i32_1 = arith.constant 0 : i32
    return %c0_i32, %c0_i32_0 : i32, i32
  }
  func.func @transform_4(%arg0: i32) -> (i32, i32) {
    %c0_i32 = arith.constant 0 : i32
    %c0_i32_0 = arith.constant 0 : i32
    %c0_i32_1 = arith.constant 0 : i32
    return %c0_i32, %c0_i32_0 : i32, i32
  }
  func.func @transform_5(%arg0: i32) -> (i32, i32) {
    %c0_i32 = arith.constant 0 : i32
    %c0_i32_0 = arith.constant 0 : i32
    %c0_i32_1 = arith.constant 0 : i32
    return %c0_i32, %c0_i32_0 : i32, i32
  }
  func.func @transform_6(%arg0: i32) -> (i32, i32) {
    %c0_i32 = arith.constant 0 : i32
    %c0_i32_0 = arith.constant 0 : i32
    %c0_i32_1 = arith.constant 0 : i32
    return %c0_i32, %c0_i32_0 : i32, i32
  }
  func.func @transform_7(%arg0: i32) -> (i32, i32) {
    %c0_i32 = arith.constant 0 : i32
    %c0_i32_0 = arith.constant 0 : i32
    return %arg0, %c0_i32 : i32, i32
  }
  func.func @transform_8(%arg0: i32) -> (i32, i32) {
    %c0_i32 = arith.constant 0 : i32
    %c0_i32_0 = arith.constant 0 : i32
    return %arg0, %c0_i32 : i32, i32
  }
}

</mosaic_0001>

<bundles_post_ra>
// kernel: tpu_custom_call.1
= control target key start
LH: loop header
LB: loop body
LE: loop exit
PB: predicated region body
PF: predicated region fallthrough
CT: control target
= control target key end

     0   :  { %14 = vsyncpa [#allocation3], 0  ;;  %s1169_s0 = inlined_call_operand.hbm [shape: f32[8,16], index: 0, kind: input, shape index: {}]   ;;  %s1170_s1 = inlined_call_operand.hbm [shape: bf16[16,256], index: 1, kind: input, shape index: {}]   ;;  %s1171_s2 = inlined_call_operand.hbm [shape: f32[1,256], index: 2, kind: input, shape index: {}]   ;;  %s1172_s3 = inlined_call_operand.hbm [shape: bf16[256,256], index: 3, kind: input, shape index: {}]   ;;  %s1173_s4 = inlined_call_operand.vmem [shape: f32[1,256], index: 4, kind: input, shape index: {}]   ;;  %s1174_s5 = inlined_call_operand.hbm [shape: bf16[256,128], index: 5, kind: input, shape index: {}]   ;;  %s1175_s6 = inlined_call_operand.vmem [shape: f32[1,128], index: 6, kind: input, shape index: {}]   ;;  %s1176_s7 = inlined_call_operand.hbm [shape: f32[8,8], index: 7, kind: output, shape index: {0}]   ;;  %s1177_s8 = inlined_call_operand.hbm [shape: f32[8,8], index: 8, kind: output, shape index: {1}]  }
   0x1   :  { %15 = vsyncpa [#allocation6], 0 }
   0x2   :  { %16 = vsyncpa [#allocation9], 0 }
   0x3   :  { %17 = vsyncpa [#allocation4], 0  ;;  %s34_s29 = sshll.u32 %s1170_s1, 4  ;;  %s35_s29 = int_to_ptr.hbm [resolvable:$true] %s34_s29 }
   0x4   :  { %18 = vsyncpa [#allocation13], 0  ;;  %s1082_s30 = smov [#allocation5]   ;;  %s58_s12 = sshll.u32 %s1172_s3, 4  ;;  %s59_s12 = int_to_ptr.hbm [resolvable:$true] %s58_s12 }
   0x5   :  { %s36_s9 = sshll.u32 %s1082_s30, 4  ;;  %s1083_s13 = smov 128   ;;  %s37_s9 = int_to_ptr.vmem [resolvable:$true] %s36_s9 }
   0x6   :  { %s1084_s14 = smov 8   ;;  %s1085_s15 = smov [#allocation8]  }
   0x7   :  { %42 = dma.hbm_to_vmem [thread:$0]  %s35_s29, 256, %s37_s9, [#allocation6], %s1083_s13, %s1083_s13, %s1084_s14  }
   0x8   :  { %s60_s16 = sshll.u32 %s1085_s15, 4  ;;  %s24_s19 = sshll.u32 %s1169_s0, 4  ;;  %s61_s16 = int_to_ptr.vmem [resolvable:$true] %s60_s16  ;;  %s25_s19 = int_to_ptr.hbm [resolvable:$true] %s24_s19 }
   0x9   :  { %66 = dma.hbm_to_vmem [thread:$0]  %s59_s12, 4096, %s61_s16, [#allocation9], %s1083_s13, %s1083_s13, %s1084_s14  }
   0xa   :  { %s48_s21 = sshll.u32 %s1171_s2, 4  ;;  %s1086_s22 = smov [#allocation2]   ;;  %s49_s21 = int_to_ptr.hbm [resolvable:$true] %s48_s21 }
   0xb   :  { %s26_s23 = sshll.u32 %s1086_s22, 4  ;;  %s1087_s3 = smov [#allocation7]   ;;  %s27_s23 = int_to_ptr.vmem [resolvable:$true] %s26_s23 }
   0xc   :  { %29 = dma.hbm_to_vmem [thread:$0]  %s25_s19, 128, %s27_s23, [#allocation3]  }
   0xd   :  { %s50_s24 = sshll.u32 %s1087_s3, 4  ;;  %s73_s27 = sshll.u32 %s1174_s5, 4  ;;  %s51_s24 = int_to_ptr.vmem [resolvable:$true] %s50_s24  ;;  %s74_s27 = int_to_ptr.hbm [resolvable:$true] %s73_s27 }
   0xe   :  { %53 = dma.hbm_to_vmem [thread:$0]  %s49_s21, 32, %s51_s24, [#allocation6]  }
   0xf   :  { %s1088_s0 = smov [#allocation10]   ;;  %s1089_s29 = smov 64  }
  0x10   :  { %s75_s28 = sshll.u32 %s1088_s0, 4  ;;  %s1090_s30 = smov 4   ;;  %s76_s28 = int_to_ptr.vmem [resolvable:$true] %s75_s28 }
  0x11   :  { %81 = dma.hbm_to_vmem [thread:$0]  %s74_s27, 2048, %s76_s28, [#allocation9], %s1089_s29, %s1089_s29, %s1090_s30  }
  0x12   :  { %1072 = dma.done.wait [#allocation3], 128  }
  0x13   :  { %1073 = vsyncadd [#allocation3], 4294967168 }
  0x14   :  { %1074 = dma.done.wait [#allocation6], 288  }
  0x15   :  { %1075 = vsyncadd [#allocation6], 4294967008 }
  0x16   :  { %1076 = dma.done.wait [#allocation9], 6144  }
  0x17   :  { %1077 = vsyncadd [#allocation9], 4294961152  ;;  %v636_v0 = vld [vmem:[#allocation5] sm:$0xf]  ;;  %v837_v1 = vld [vmem:[#allocation5 + $0x4] sm:$0xf0] }
  0x18   :  { %v836_v2 = vld [vmem:[#allocation5 + $0x4] sm:$0xf]  ;;  %v637_v3 = vor.u32 %v837_v1, %v636_v0  ;;  %v638_v4 = vld [vmem:[#allocation5 + $0x8] sm:$0xf0]  ;;  %v105_v5 = vld [vmem:[#allocation2] sm:$0xff]  ;;  %vm125_vm0 = vcmask 130048  }
  0x19   :  { %v702_v6 = vld [vmem:[#allocation8 + $0x70] sm:$0xf]  ;;  %v641_v7 = vor.u32 %v836_v2, %v638_v4  ;;  %v106_v8 = vpack.c.bf16 %v105_v5, %v105_v5  ;;  %v853_v9 = vld [vmem:[#allocation8 + $0x74] sm:$0xf0]  ;;  %v852_v14 = vld [vmem:[#allocation8 + $0x74] sm:$0xf] }
  0x1a   :  { %v766_v10 = vld [vmem:[#allocation8 + $0xf0] sm:$0xf]  ;;  %v869_v11 = vld [vmem:[#allocation8 + $0xf4] sm:$0xf0]  ;;  %136 = vmatpush.bf16.msra.mxu0 %v637_v3  ;;  %v703_v12 = vor.u32 %v853_v9, %v702_v6  ;;  %v704_v15 = vld [vmem:[#allocation8 + $0x78] sm:$0xf0] }
  0x1b   :  { %v767_v13 = vor.u32 %v869_v11, %v766_v10  ;;  %v868_v16 = vld [vmem:[#allocation8 + $0xf4] sm:$0xf]  ;;  %149 = vmatpush.bf16.msra.mxu1 %v641_v7  ;;  %v707_v17 = vor.u32 %v852_v14, %v704_v15  ;;  %v768_v18 = vld [vmem:[#allocation8 + $0xf8] sm:$0xf0]  ;;  %v694_v19 = vld [vmem:[#allocation8 + $0x60] sm:$0xf] }
  0x1c   :  { %v851_v20 = vld [vmem:[#allocation8 + $0x64] sm:$0xf0]  ;;  %357 = vmatpush.bf16.msra.mxu2 %v703_v12  ;;  %v771_v21 = vor.u32 %v868_v16, %v768_v18  ;;  %v758_v23 = vld [vmem:[#allocation8 + $0xe0] sm:$0xf]  ;;  %v850_v25 = vld [vmem:[#allocation8 + $0x64] sm:$0xf] }
  0x1d   :  { %370 = vmatpush.bf16.msra.mxu3 %v767_v13  ;;  %v695_v22 = vor.u32 %v851_v20, %v694_v19  ;;  %v867_v24 = vld [vmem:[#allocation8 + $0xe4] sm:$0xf0]  ;;  %642 = vmatmul.msk.bf16.vlgmr.msra.gmra.mxu0 %vm125_vm0, %v106_v8  ;;  %v696_v27 = vld [vmem:[#allocation8 + $0x68] sm:$0xf0]  ;;  %v866_v28 = vld [vmem:[#allocation8 + $0xe4] sm:$0xf] }
  0x1e   :  { %v759_v26 = vor.u32 %v867_v24, %v758_v23  ;;  %v760_v29 = vld [vmem:[#allocation8 + $0xe8] sm:$0xf0]  ;;  %643 = vmatmul.msk.bf16.vlgmr.msra.gmra.mxu1 %vm125_vm0, %v106_v8  ;;  %383 = vmatpush.bf16.msrb.mxu0 %v707_v17  ;;  %v699_v30 = vor.u32 %v850_v25, %v696_v27  ;;  %v686_v31 = vld [vmem:[#allocation8 + $0x50] sm:$0xf]  ;;  %v849_v32 = vld [vmem:[#allocation8 + $0x54] sm:$0xf0] }
  0x1f   :  { %v750_v33 = vld [vmem:[#allocation8 + $0xd0] sm:$0xf]  ;;  %396 = vmatpush.bf16.msrb.mxu1 %v771_v21  ;;  %v763_v34 = vor.u32 %v866_v28, %v760_v29  ;;  %v865_v35 = vld [vmem:[#allocation8 + $0xd4] sm:$0xf0]  ;;  %v848_v36 = vld [vmem:[#allocation8 + $0x54] sm:$0xf]  ;;  %v687_v38 = vor.u32 %v849_v32, %v686_v31 }
  0x20   :  { %v688_v37 = vld [vmem:[#allocation8 + $0x58] sm:$0xf0]  ;;  %358 = vmatpush.bf16.msra.mxu2 %v695_v22  ;;  %v751_v39 = vor.u32 %v865_v35, %v750_v33  ;;  %v864_v40 = vld [vmem:[#allocation8 + $0xd4] sm:$0xf]  ;;  %v678_v42 = vld [vmem:[#allocation8 + $0x40] sm:$0xf] }
  0x21   :  { %371 = vmatpush.bf16.msra.mxu3 %v759_v26  ;;  %v752_v41 = vld [vmem:[#allocation8 + $0xd8] sm:$0xf0]  ;;  %v847_v43 = vld [vmem:[#allocation8 + $0x44] sm:$0xf0]  ;;  %v742_v44 = vld [vmem:[#allocation8 + $0xc0] sm:$0xf]  ;;  %v691_v46 = vor.u32 %v848_v36, %v688_v37 }
  0x22   :  { %v863_v45 = vld [vmem:[#allocation8 + $0xc4] sm:$0xf0]  ;;  %384 = vmatpush.bf16.msrb.mxu0 %v699_v30  ;;  %v755_v47 = vor.u32 %v864_v40, %v752_v41  ;;  %v846_v48 = vld [vmem:[#allocation8 + $0x44] sm:$0xf]  ;;  %v680_v49 = vld [vmem:[#allocation8 + $0x48] sm:$0xf0]  ;;  %v679_v50 = vor.u32 %v847_v43, %v678_v42 }
  0x23   :  { %397 = vmatpush.bf16.msrb.mxu1 %v763_v34  ;;  %v743_v51 = vor.u32 %v863_v45, %v742_v44  ;;  %v862_v52 = vld [vmem:[#allocation8 + $0xc4] sm:$0xf]  ;;  %v744_v53 = vld [vmem:[#allocation8 + $0xc8] sm:$0xf0]  ;;  %v670_v54 = vld [vmem:[#allocation8 + $0x30] sm:$0xf]  ;;  %v683_v58 = vor.u32 %v846_v48, %v680_v49 }
  0x24   :  { %359 = vmatpush.bf16.msra.mxu2 %v687_v38  ;;  %v845_v55 = vld [vmem:[#allocation8 + $0x34] sm:$0xf0]  ;;  %v734_v56 = vld [vmem:[#allocation8 + $0xb0] sm:$0xf]  ;;  %v747_v59 = vor.u32 %v862_v52, %v744_v53  ;;  %v844_v60 = vld [vmem:[#allocation8 + $0x34] sm:$0xf] }
  0x25   :  { %372 = vmatpush.bf16.msra.mxu3 %v751_v39  ;;  %v861_v57 = vld [vmem:[#allocation8 + $0xb4] sm:$0xf0]  ;;  %v672_v61 = vld [vmem:[#allocation8 + $0x38] sm:$0xf0]  ;;  %v860_v62 = vld [vmem:[#allocation8 + $0xb4] sm:$0xf]  ;;  %v671_v63 = vor.u32 %v845_v55, %v670_v54 }
  0x26   :  { %385 = vmatpush.bf16.msrb.mxu0 %v691_v46  ;;  %v735_v0 = vor.u32 %v861_v57, %v734_v56  ;;  %v736_v1 = vld [vmem:[#allocation8 + $0xb8] sm:$0xf0]  ;;  %v662_v2 = vld [vmem:[#allocation8 + $0x20] sm:$0xf]  ;;  %v843_v3 = vld [vmem:[#allocation8 + $0x24] sm:$0xf0]  ;;  %v675_v6 = vor.u32 %v844_v60, %v672_v61 }
  0x27   :  { %398 = vmatpush.bf16.msrb.mxu1 %v755_v47  ;;  %v726_v4 = vld [vmem:[#allocation8 + $0xa0] sm:$0xf]  ;;  %v859_v5 = vld [vmem:[#allocation8 + $0xa4] sm:$0xf0]  ;;  %v739_v7 = vor.u32 %v860_v62, %v736_v1  ;;  %v842_v8 = vld [vmem:[#allocation8 + $0x24] sm:$0xf]  ;;  %v663_v10 = vor.u32 %v843_v3, %v662_v2 }
  0x28   :  { %360 = vmatpush.bf16.msra.mxu2 %v679_v50  ;;  %v664_v9 = vld [vmem:[#allocation8 + $0x28] sm:$0xf0]  ;;  %v727_v11 = vor.u32 %v859_v5, %v726_v4  ;;  %v858_v12 = vld [vmem:[#allocation8 + $0xa4] sm:$0xf]  ;;  %v654_v16 = vld [vmem:[#allocation8 + $0x10] sm:$0xf] }
  0x29   :  { %373 = vmatpush.bf16.msra.mxu3 %v743_v51  ;;  %v728_v13 = vld [vmem:[#allocation8 + $0xa8] sm:$0xf0]  ;;  %v667_v14 = vor.u32 %v842_v8, %v664_v9  ;;  %v841_v17 = vld [vmem:[#allocation8 + $0x14] sm:$0xf0]  ;;  %v718_v18 = vld [vmem:[#allocation8 + $0x90] sm:$0xf] }
  0x2a   :  { %386 = vmatpush.bf16.msrb.mxu0 %v683_v58  ;;  %v731_v15 = vor.u32 %v858_v12, %v728_v13  ;;  %v655_v19 = vor.u32 %v841_v17, %v654_v16  ;;  %v857_v20 = vld [vmem:[#allocation8 + $0x94] sm:$0xf0]  ;;  %v840_v21 = vld [vmem:[#allocation8 + $0x14] sm:$0xf]  ;;  %v656_v22 = vld [vmem:[#allocation8 + $0x18] sm:$0xf0] }
  0x2b   :  { %399 = vmatpush.bf16.msrb.mxu1 %v747_v59  ;;  %v719_v23 = vor.u32 %v857_v20, %v718_v18  ;;  %v659_v24 = vor.u32 %v840_v21, %v656_v22  ;;  %v856_v25 = vld [vmem:[#allocation8 + $0x94] sm:$0xf]  ;;  %v720_v26 = vld [vmem:[#allocation8 + $0x98] sm:$0xf0]  ;;  %v646_v28 = vld [vmem:[#allocation8] sm:$0xf] }
  0x2c   :  { %361 = vmatpush.bf16.msra.mxu2 %v671_v63  ;;  %v723_v27 = vor.u32 %v856_v25, %v720_v26  ;;  %v839_v29 = vld [vmem:[#allocation8 + $0x4] sm:$0xf0]  ;;  %v710_v30 = vld [vmem:[#allocation8 + $0x80] sm:$0xf]  ;;  %v838_v33 = vld [vmem:[#allocation8 + $0x4] sm:$0xf] }
  0x2d   :  { %374 = vmatpush.bf16.msra.mxu3 %v735_v0  ;;  %v647_v31 = vor.u32 %v839_v29, %v646_v28  ;;  %v855_v32 = vld [vmem:[#allocation8 + $0x84] sm:$0xf0]  ;;  %v648_v34 = vld [vmem:[#allocation8 + $0x8] sm:$0xf0]  ;;  %v854_v37 = vld [vmem:[#allocation8 + $0x84] sm:$0xf] }
  0x2e   :  { %387 = vmatpush.bf16.msrb.mxu0 %v675_v6  ;;  %v711_v35 = vor.u32 %v855_v32, %v710_v30  ;;  %v651_v36 = vor.u32 %v838_v33, %v648_v34  ;;  %v712_v38 = vld [vmem:[#allocation8 + $0x88] sm:$0xf0]  ;;  %v885_v40 = vld [vmem:[#allocation10 + $0x78] sm:$0xff]  ;;  %v884_v42 = vld [vmem:[#allocation10 + $0x70] sm:$0xff]  ;;  %s1091_s10 = smov [#allocation12]   ;;  %s617_s13 = sshll.u32 %s1177_s8, 4  ;;  %s618_s13 = int_to_ptr.hbm [resolvable:$true] %s617_s13 }
  0x2f   :  { %400 = vmatpush.bf16.msrb.mxu1 %v739_v7  ;;  %v715_v39 = vor.u32 %v854_v37, %v712_v38  ;;  %v877_v41 = vld [vmem:[#allocation10 + $0x38] sm:$0xff]  ;;  %v876_v43 = vld [vmem:[#allocation10 + $0x30] sm:$0xff]  ;;  %v883_v44 = vld [vmem:[#allocation10 + $0x68] sm:$0xff]  ;;  %vm596_vm1 = vcmask 64512   ;;  %s1092_s14 = smov [#allocation11]   ;;  %s606_s17 = sshll.u32 %s1176_s7, 4  ;;  %s607_s17 = int_to_ptr.hbm [resolvable:$true] %s606_s17 }
  0x30   :  { %362 = vmatpush.bf16.msra.mxu2 %v663_v10  ;;  %v875_v45 = vld [vmem:[#allocation10 + $0x28] sm:$0xff]  ;;  %v882_v46 = vld [vmem:[#allocation10 + $0x60] sm:$0xff]  ;;  %v881_v48 = vld [vmem:[#allocation10 + $0x58] sm:$0xff]  ;;  %s604_s15 = sshll.u32 %s1092_s14, 4  ;;  %s605_s15 = int_to_ptr.vmem [resolvable:$true] %s604_s15 }
  0x31   :  { %375 = vmatpush.bf16.msra.mxu3 %v727_v11  ;;  %v874_v47 = vld [vmem:[#allocation10 + $0x20] sm:$0xff]  ;;  %v109_v49 = vld [vmem:[#allocation7] sm:$0x3]  ;;  %v880_v50 = vld [vmem:[#allocation10 + $0x50] sm:$0xff] }
  0x32   :  { %388 = vmatpush.bf16.msrb.mxu0 %v667_v14  ;;  %v111_v51 = vperm.slane %v109_v49, 0  ;;  %v112_v52 = vperm.slane %v109_v49, 1  ;;  %v873_v63 = vld [vmem:[#allocation10 + $0x18] sm:$0xff]  ;;  %v879_v0 = vld [vmem:[#allocation10 + $0x48] sm:$0xff]  ;;  %v872_v1 = vld [vmem:[#allocation10 + $0x10] sm:$0xff] }
  0x33   :  { %401 = vmatpush.bf16.msrb.mxu1 %v731_v15  ;;  %v878_v2 = vld [vmem:[#allocation10 + $0x40] sm:$0xff]  ;;  %v871_v3 = vld [vmem:[#allocation10 + $0x8] sm:$0xff] }
  0x34   :  { %363 = vmatpush.bf16.msra.mxu2 %v655_v19  ;;  %v870_v4 = vld [vmem:[#allocation10] sm:$0xff] }
  0x35   :  { %376 = vmatpush.bf16.msra.mxu3 %v719_v23  ;;  %v191_v5 = vld [vmem:[%s1173_s4] sm:$0x3] }
  0x36   :  { %389 = vmatpush.bf16.msrb.mxu0 %v659_v24  ;;  %v194_v6 = vperm.slane %v191_v5, 1  ;;  %v193_v11 = vperm.slane %v191_v5, 0  ;;  %v897_v25 = vld [vmem:[%s1175_s6] ss:$0 sm:$0xff]  ;;  %s615_s6 = sshll.u32 %s1091_s10, 4  ;;  %s616_s6 = int_to_ptr.vmem [resolvable:$true] %s615_s6 }
  0x37   :  { %402 = vmatpush.bf16.msrb.mxu1 %v723_v27 }
  0x38   :  { %364 = vmatpush.bf16.msra.mxu2 %v647_v31 }
  0x39   :  { %377 = vmatpush.bf16.msra.mxu3 %v711_v35 }
  0x3a   :  { %390 = vmatpush.bf16.msrb.mxu0 %v651_v36 }
  0x3b   :  { %403 = vmatpush.bf16.msrb.mxu1 %v715_v39 }
  0x3c   :  { %545 = vmatpush.bf16.msrb.mxu2 %v877_v41 }
  0x3d   :  { %558 = vmatpush.bf16.msrb.mxu3 %v885_v40 }
  0x40   :  { %546 = vmatpush.bf16.msrb.mxu2 %v876_v43 }
  0x41   :  { %559 = vmatpush.bf16.msrb.mxu3 %v884_v42 }
  0x44   :  { %547 = vmatpush.bf16.msrb.mxu2 %v875_v45 }
  0x45   :  { %560 = vmatpush.bf16.msrb.mxu3 %v883_v44 }
  0x48   :  { %548 = vmatpush.bf16.msrb.mxu2 %v874_v47 }
  0x49   :  { %561 = vmatpush.bf16.msrb.mxu3 %v882_v46 }
  0x4c   :  { %549 = vmatpush.bf16.msrb.mxu2 %v873_v63 }
  0x4d   :  { %562 = vmatpush.bf16.msrb.mxu3 %v881_v48 }
  0x50   :  { %550 = vmatpush.bf16.msrb.mxu2 %v872_v1 }
  0x51   :  { %563 = vmatpush.bf16.msrb.mxu3 %v880_v50 }
  0x54   :  { %551 = vmatpush.bf16.msrb.mxu2 %v871_v3 }
  0x55   :  { %564 = vmatpush.bf16.msrb.mxu3 %v879_v0 }
  0x58   :  { %552 = vmatpush.bf16.msrb.mxu2 %v870_v4 }
  0x59   :  { %565 = vmatpush.bf16.msrb.mxu3 %v878_v2 }
  0x9a   :  { %v138_v53 = vpop.f32.mrf.mxu0 }
  0x9b   :  { %v139_v54 = vadd.f32 %v138_v53, %v111_v51  ;;  %v151_v55 = vpop.f32.mrf.mxu1 }
  0x9c   :  { %v152_v56 = vadd.f32 %v151_v55, %v112_v52 }
  0x9d   :  { %v155_v57 = vmax.f32 %v139_v54, 0.0 }
  0x9e   :  { %v156_v58 = vmax.f32 %v152_v56, 0.0 }
  0x9f   :  { %v157_v59 = vpack.c.bf16 %v155_v57, %v155_v57 }
  0xa0   :  { %v158_v60 = vpack.c.bf16 %v156_v58, %v156_v58 }
  0xa1   :  { %365 = vmatmul.bf16.vlgmr.msra.gmra.mxu2 %v157_v59  ;;  %391 = vmatmul.bf16.vlgmr.msrb.gmra.mxu0 %v157_v59 }
  0xa2   :  { %378 = vmatmul.bf16.vlgmr.msra.gmra.mxu3 %v158_v60  ;;  %404 = vmatmul.bf16.vlgmr.msrb.gmra.mxu1 %v158_v60  ;;  %v140_v61 = vpop.f32.mrf.mxu0 }
  0xa3   :  { %v153_v62 = vpop.f32.mrf.mxu1 }
 0x11e   :  { %v392_v7 = vpop.f32.mrf.mxu0 }
 0x11f   :  { %v393_v8 = vadd.f32 %v392_v7, %v194_v6  ;;  %v405_v9 = vpop.f32.mrf.mxu1 }
 0x121   :  { %v406_v10 = vadd.f32 %v405_v9, %v393_v8 }
 0x123   :  { %v410_v12 = vmax.f32 %v406_v10, 0.0 }
 0x124   :  { %v366_v13 = vpop.f32.mrf.mxu2 }
 0x125   :  { %v412_v14 = vpack.c.bf16 %v410_v12, %v410_v12  ;;  %v367_v15 = vadd.f32 %v366_v13, %v193_v11  ;;  %v379_v16 = vpop.f32.mrf.mxu3 }
 0x126   :  { %v394_v17 = vpop.f32.mrf.mxu0 }
 0x127   :  { %v380_v18 = vadd.f32 %v379_v16, %v367_v15  ;;  %v407_v19 = vpop.f32.mrf.mxu1  ;;  %566 = vmatmul.bf16.vlgmr.msrb.gmra.mxu3 %v412_v14 }
 0x129   :  { %v409_v20 = vmax.f32 %v380_v18, 0.0 }
 0x12b   :  { %v411_v21 = vpack.c.bf16 %v409_v20, %v409_v20 }
 0x12c   :  { %v368_v22 = vpop.f32.mrf.mxu2 }
 0x12d   :  { %v381_v23 = vpop.f32.mrf.mxu3  ;;  %553 = vmatmul.bf16.vlgmr.msrb.gmra.mxu2 %v411_v21 }
 0x1aa   :  { %v567_v24 = vpop.f32.mrf.mxu3 }
 0x1b0   :  { %v554_v26 = vpop.f32.mrf.mxu2 }
 0x1b1   :  { %v555_v27 = vadd.f32 %v897_v25, %v554_v26 }
 0x1b2   :  { %v569_v28 = vpop.f32.mrf.mxu3 }
 0x1b3   :  { %v568_v29 = vadd.f32 %v567_v24, %v555_v27 }
 0x1b5   :  { %571 = vmax.xlane.f32.xlu0 %v568_v29 }
 0x1b8   :  { %v556_v30 = vpop.f32.mrf.mxu2 }
 0x228   :  { %v572_v31 = vpop.xlane.xlu0 %571 }
 0x229   :  { %v573_v32 = vsub.f32 %v568_v29, %v572_v31 }
 0x22b   :  { %v574_v33 = vmul.f32 1.442695, %v573_v32 }
 0x22d   :  { %898 = vpow2.f32 %v574_v33 }
 0x233   :  { %v899_v34 = vpop.eup %898 }
 0x234   :  { %576 = vadd.xlane.f32.xlu0 %v899_v34 }
 0x2a7   :  { %v577_v35 = vpop.xlane.xlu0 %576 }
 0x2a8   :  { %900 = vrcp.f32 %v577_v35  ;;  %v589_v41 = vand.u32 2147483648, %v577_v35  ;;  %v587_v44 = vand.u32 2147483647, %v577_v35  ;;  %vm583_vm3 = vweird.f32 %v577_v35 }
 0x2a9   :  { %902 = vlog2.f32 %v577_v35 }
 0x2aa   :  { %v590_v46 = vor.u32 1.1754944e-38, %v589_v41  ;;  %vm588_vm5 = vcmp.eq.f32.partialorder %v587_v44, 8.507059e+37 }
 0x2ae   :  { %v901_v36 = vpop.eup %900 }
 0x2af   :  { %v903_v37 = vpop.eup %902  ;;  %v579_v38 = vmul.f32 %v901_v36, %v577_v35  ;;  %vm584_vm2 = vweird.f32 %v901_v36 }
 0x2b0   :  { %v594_v39 = vmul.f32 0.6931472, %v903_v37  ;;  %vm585_vm4 = vmor %vm583_vm3, %vm584_vm2 }
 0x2b1   :  { %v580_v40 = vsub.f32 1.0, %v579_v38 }
 0x2b2   :  { %v595_v42 = vsub.f32 %v573_v32, %v594_v39 }
 0x2b3   :  { %v581_v43 = vmul.f32 %v901_v36, %v580_v40 }
 0x2b4   :  { %598 = vst.msk [vmem:[#allocation12] sm:$0xff] %vm596_vm1, %v595_v42 }
 0x2b5   :  { %v582_v45 = vadd.f32 %v901_v36, %v581_v43  ;;  %620 = dma.vmem_to_hbm [thread:$0]  %s616_s6, 128, %s618_s13, [#allocation13]  }
 0x2b7   :  { %v586_v47 = vsel %vm585_vm4, %v901_v36, %v582_v45 }
 0x2b8   :  { %v591_v48 = vsel %vm588_vm5, %v590_v46, %v586_v47 }
 0x2b9   :  { %v592_v49 = vmul.f32 %v899_v34, %v591_v48 }
 0x2bb   :  { %597 = vst.msk [vmem:[#allocation11] sm:$0xff] %vm596_vm1, %v592_v49 }
 0x2bc   :  { %609 = dma.vmem_to_hbm [thread:$0]  %s605_s15, 128, %s607_s17, [#allocation4]  }
 0x2bd   :  { %1078 = dma.done.wait [#allocation4], 128  }
 0x2be   :  { %1079 = vsyncadd [#allocation4], 4294967168 }
 0x2bf   :  { %1080 = dma.done.wait [#allocation13], 128  }
 0x2c0   :  { %1081 = vsyncadd [#allocation13], 4294967168 }
 0x2c1   :  { %629 = vsyncpa [#allocation3], 1 }
 0x2c2   :  { %630 = vsyncpa [#allocation6], 1 }
 0x2c3   :  { %631 = vsyncpa [#allocation9], 1 }
 0x2c4   :  { %632 = vsyncpa [#allocation4], 1 }
 0x2c5   :  { %633 = vsyncpa [#allocation13], 1 }

</bundles_post_ra>
